<compile_context>
chip_gen: v7x
topology: tpu7x:2x2x1
jax: 0.10.0
libtpu: 0.0.40
codegen_flags: <defaults>
</compile_context>

<pallas_src>
import jax
import jax.numpy as jnp
from jax.experimental import pallas as pl
from jax.experimental.pallas import tpu as pltpu

_MIB = 1024 * 1024


def _attention_kernel(hidden_ref, enc_ref, out_ref, scores_ref):
    """Blocks: hidden (TB,H); enc (TS,TB,H); out (S,TB); scratch scores (S_pad,TB) f32."""
    s = pl.program_id(1)
    ns = pl.num_programs(1)
    TS = enc_ref.shape[0]
    S = out_ref.shape[0]

    h = hidden_ref[...]                                     # (TB, H), input dtype
    e = enc_ref[...]                                        # (TS, TB, H), input dtype

    # Dot score: multiply in native dtype; widen to f32 *inside* the H (lane) reduce
    # (no widened (TS, TB, H) product is materialized).
    sc = jnp.sum(h[None, :, :] * e, axis=-1, dtype=jnp.float32)    # (TS, TB)

    start = s * TS
    if TS % 8 == 0:
        start = pl.multiple_of(start, 8)
    scores_ref[pl.ds(start, TS), :] = sc

    # Finalize: numerically-stable softmax over the full sequence (sublane axis)
    # once every sequence tile has landed in the scratch.
    @pl.when(s == ns - 1)
    def _():
        all_sc = scores_ref[...]                            # (S_pad, TB), f32
        if scores_ref.shape[0] > S:                         # mask ragged / padded rows
            row = jax.lax.broadcasted_iota(jnp.int32, scores_ref.shape, 0)
            all_sc = jnp.where(row < S, all_sc, -jnp.inf)
        m = jnp.max(all_sc, axis=0, keepdims=True)          # (1, TB)
        p = jnp.exp(all_sc - m)                             # (S_pad, TB)
        denom = jnp.sum(p, axis=0, keepdims=True)           # (1, TB)
        w = p * pl.reciprocal(denom, approx=True)           # reciprocal on EUP slot
        out_ref[...] = w[:S, :].astype(out_ref.dtype)


def _cdiv(a, b):
    return -(-a // b)


def _round_up(x, m):
    return _cdiv(x, m) * m


def _vmem_budget():
    """Generation-aware (budget, vmem_limit_bytes) derived from physical VMEM."""
    try:
        cap = int(pltpu.get_tpu_info().vmem_capacity_bytes)
    except Exception:
        cap = 0
    if cap <= 0:
        cap = 64 * _MIB                       # conservative default (v7x per-TC VMEM)
    cap = min(cap, 128 * _MIB)
    limit = cap - 8 * _MIB                    # 120 MiB on v5e/v6e, 56 MiB on v7x
    budget = limit - 8 * _MIB                 # headroom for compiler-internal scratch
    return budget, limit


def _block_bytes(S, ts, tb, H, in_isz, out_isz):
    enc = ts * tb * H * in_isz                # encoder block
    hid = tb * H * in_isz                     # hidden block
    out = S * tb * out_isz                    # resident output block
    scr = _cdiv(S, ts) * ts * tb * 4          # f32 score scratch (seq padded to tile)
    return 2 * (enc + hid + out) + scr        # x2: double-buffered pipelining


def _choose_tiles(S, B, H, in_isz, out_isz, budget):
    """Pick (TB, TS) so the blocks fit the per-generation VMEM budget and the grid
    has enough steps to pipeline DMA with compute (and feed both v7x TCs)."""
    min_ts = min(S, 8)

    # --- batch tile: lane dim of the (S, TB) output block ---
    if B <= 128:
        tb = B                                              # equal-to-full-dim path
    else:
        # >= 8 lane-dense (multiple-of-128) batch tiles when B is large.
        tb = min(_round_up(B, 128), max(128, _round_up(_cdiv(B, 8), 128)))
        while tb > 128 and _block_bytes(S, min_ts, tb, H, in_isz, out_isz) > budget:
            tb -= 128

    assert _block_bytes(S, min_ts, tb, H, in_isz, out_isz) <= budget, (
        "Attention blocks do not fit VMEM even at the minimum tile size "
        f"(S={S}, B={B}, H={H}); a streaming two-pass softmax would be required.")

    # --- sequence tile: largest multiple of 8 (or full S) that fits the budget ---
    fixed = 2 * (tb * H * in_isz + S * tb * out_isz) + S * tb * 4
    per_row = 2 * tb * H * in_isz + tb * 4
    avail = budget - fixed
    ts = min(S, max(min_ts, (avail // per_row) // 8 * 8))
    while ts > min_ts and _block_bytes(S, ts, tb, H, in_isz, out_isz) > budget:
        ts -= 8

    # Guarantee >= 2 grid steps whenever there is meaningful data to pipeline.
    if _cdiv(B, tb) * _cdiv(S, ts) == 1 and S * B * H * in_isz > 2 * _MIB and S >= 16:
        ts = _round_up(_cdiv(S, 2), 8)

    return tb, ts


@jax.jit
def attention_forward(hidden, encoder_outputs):
    """hidden: (1, B, H), encoder_outputs: (S, B, H)  ->  (B, 1, S)."""
    S, B, H = encoder_outputs.shape
    assert hidden.shape == (1, B, H)

    h_k = hidden[0]                                         # (B, H): trivial squeeze
    out_dtype = encoder_outputs.dtype
    in_isz = jnp.dtype(encoder_outputs.dtype).itemsize
    out_isz = jnp.dtype(out_dtype).itemsize

    budget, vmem_limit = _vmem_budget()
    TB, TS = _choose_tiles(S, B, H, in_isz, out_isz, budget)
    nb, ns = _cdiv(B, TB), _cdiv(S, TS)

    cost = pl.CostEstimate(
        flops=2 * S * B * H,
        transcendentals=S * B,
        bytes_accessed=S * B * H * in_isz + B * H * in_isz + S * B * out_isz,
    )

    out_sb = pl.pallas_call(
        _attention_kernel,
        out_shape=jax.ShapeDtypeStruct((S, B), out_dtype),
        grid_spec=pltpu.PrefetchScalarGridSpec(
            num_scalar_prefetch=0,
            grid=(nb, ns),                                   # (batch tiles, seq tiles)
            in_specs=[
                pl.BlockSpec((TB, H), lambda i, s: (i, 0)),          # hidden  (B, H)
                pl.BlockSpec((TS, TB, H), lambda i, s: (s, i, 0)),   # encoder (S, B, H)
            ],
            out_specs=pl.BlockSpec((S, TB), lambda i, s: (0, i)),    # weights (S, B)
            scratch_shapes=[pltpu.VMEM((ns * TS, TB), jnp.float32)],
        ),
        compiler_params=pltpu.CompilerParams(
            dimension_semantics=("parallel", "arbitrary"),
            vmem_limit_bytes=vmem_limit,
        ),
        cost_estimate=cost,
    )(h_k, encoder_outputs)

    # Only the tiny (S, B) weight matrix is transposed outside the kernel.
    return jnp.transpose(out_sb)[:, None, :]                # (B, 1, S)


def _reference(hidden, encoder_outputs):
    scores = jnp.sum(hidden * encoder_outputs, axis=2)       # (S, B)
    w = jax.nn.softmax(scores.T, axis=1)                     # (B, S)
    return w[:, None, :]                                     # (B, 1, S)


if __name__ == "__main__":
    # Attention(hidden_size=32); seq=8, batch=2
    S, B, H = 8, 2, 32
    key = jax.random.PRNGKey(0)
    k1, k2 = jax.random.split(key)
    hidden = jax.random.normal(k1, (1, B, H), dtype=jnp.float32)
    encoder_outputs = jax.random.normal(k2, (S, B, H), dtype=jnp.float32)

    out = jax.block_until_ready(attention_forward(hidden, encoder_outputs))
    ref = _reference(hidden, encoder_outputs)

    assert out.shape == (B, 1, S), out.shape
    # approx EUP reciprocal has ~2^-12 relative error -> slightly loosened tolerance
    assert jnp.allclose(out, ref, atol=2e-3, rtol=2e-3), "mismatch vs reference"
    print("KERNEL_OK")
</pallas_src>

<mosaic_0001>
module attributes {stable_mosaic.version = 11 : i64} {
  func.func @_attention_kernel(%arg0: i32, %arg1: i32, %arg2: memref<2x32xf32, #tpu.memory_space<vmem>>, %arg3: memref<8x2x32xf32, #tpu.memory_space<vmem>>, %arg4: memref<8x2xf32, #tpu.memory_space<vmem>>, %arg5: memref<8x2xf32, #tpu.memory_space<vmem>>) attributes {dimension_semantics = [#tpu.dimension_semantics<parallel>, #tpu.dimension_semantics<arbitrary>], iteration_bounds = array<i64: 1, 1>, scalar_prefetch = 0 : i64, scratch_operands = 1 : i64, tpu.core_type = #tpu.core_type<tc>, window_params = [{transform_indices = @transform_0, window_bounds = array<i64: 2, 32>}, {transform_indices = @transform_1, window_bounds = array<i64: 8, 2, 32>}, {transform_indices = @transform_2, window_bounds = array<i64: 8, 2>}]} {
    %c0 = arith.constant 0 : index
    %c0_0 = arith.constant 0 : index
    %0 = vector.load %arg2[%c0, %c0_0] : memref<2x32xf32, #tpu.memory_space<vmem>>, vector<2x32xf32>
    %c0_1 = arith.constant 0 : index
    %c0_2 = arith.constant 0 : index
    %c0_3 = arith.constant 0 : index
    %1 = vector.load %arg3[%c0_1, %c0_2, %c0_3] : memref<8x2x32xf32, #tpu.memory_space<vmem>>, vector<8x2x32xf32>
    %2 = vector.shape_cast %0 : vector<2x32xf32> to vector<1x2x32xf32>
    %3 = vector.broadcast %2 : vector<1x2x32xf32> to vector<8x2x32xf32>
    %4 = arith.mulf %3, %1 : vector<8x2x32xf32>
    %cst = arith.constant dense<0.000000e+00> : vector<8x2xf32>
    %5 = vector.multi_reduction <add>, %4, %cst [2] : vector<8x2x32xf32> to vector<8x2xf32>
    %c8_i32 = arith.constant 8 : i32
    %6 = arith.muli %arg1, %c8_i32 : i32
    %7 = tpu.assume_multiple %6, 8 : i32
    %8 = arith.index_cast %7 : i32 to index
    %c0_4 = arith.constant 0 : index
    %9 = vector.load %arg5[%8, %c0_4] : memref<8x2xf32, #tpu.memory_space<vmem>>, vector<8x2xf32>
    tpu.vector_store %arg5[%8, %c0_4], %5 {strides = array<i32>} : memref<8x2xf32, #tpu.memory_space<vmem>>, vector<8x2xf32>,
    %c0_i32 = arith.constant 0 : i32
    %10 = arith.cmpi eq, %arg1, %c0_i32 : i32
    %11 = arith.extui %10 : i1 to i32
    %c0_i32_5 = arith.constant 0 : i32
    %12 = arith.cmpi ne, %11, %c0_i32_5 : i32
    scf.if %12 {
      %c0_6 = arith.constant 0 : index
      %c0_7 = arith.constant 0 : index
      %13 = vector.load %arg5[%c0_6, %c0_7] : memref<8x2xf32, #tpu.memory_space<vmem>>, vector<8x2xf32>
      %cst_8 = arith.constant dense<0xFF800000> : vector<2xf32>
      %14 = vector.multi_reduction <maximumf>, %13, %cst_8 [0] : vector<8x2xf32> to vector<2xf32>
      %15 = vector.shape_cast %14 : vector<2xf32> to vector<1x2xf32>
      %16 = vector.broadcast %15 : vector<1x2xf32> to vector<8x2xf32>
      %17 = arith.subf %13, %16 : vector<8x2xf32>
      %18 = math.exp %17 : vector<8x2xf32>
      %cst_9 = arith.constant dense<0.000000e+00> : vector<2xf32>
      %19 = vector.multi_reduction <add>, %18, %cst_9 [0] : vector<8x2xf32> to vector<2xf32>
      %20 = vector.shape_cast %19 : vector<2xf32> to vector<1x2xf32>
      %21 = tpu.reciprocal %20 {approx = true} : vector<1x2xf32> -> vector<1x2xf32>
      %22 = vector.broadcast %21 : vector<1x2xf32> to vector<8x2xf32>
      %23 = arith.mulf %18, %22 : vector<8x2xf32>
      %c0_10 = arith.constant 0 : index
      %c0_11 = arith.constant 0 : index
      %24 = vector.load %arg4[%c0_10, %c0_11] : memref<8x2xf32, #tpu.memory_space<vmem>>, vector<8x2xf32>
      tpu.vector_store %arg4[%c0_10, %c0_11], %23 {strides = array<i32>} : memref<8x2xf32, #tpu.memory_space<vmem>>, vector<8x2xf32>,
    } else {
    }
    return
  }
  func.func @transform_0(%arg0: i32, %arg1: i32) -> (i32, i32) {
    %c0_i32 = arith.constant 0 : i32
    %c0_i32_0 = arith.constant 0 : i32
    return %arg0, %c0_i32 : i32, i32
  }
  func.func @transform_1(%arg0: i32, %arg1: i32) -> (i32, i32, i32) {
    %c0_i32 = arith.constant 0 : i32
    %c0_i32_0 = arith.constant 0 : i32
    return %arg1, %arg0, %c0_i32 : i32, i32, i32
  }
  func.func @transform_2(%arg0: i32, %arg1: i32) -> (i32, i32) {
    %c0_i32 = arith.constant 0 : i32
    %c0_i32_0 = arith.constant 0 : i32
    return %c0_i32, %arg0 : i32, i32
  }
}

</mosaic_0001>

<bundles_post_ra>
// kernel: attention_forward.1
= control target key start
LH: loop header
LB: loop body
LE: loop exit
PB: predicated region body
PF: predicated region fallthrough
CT: control target
= control target key end

     0   :  { %7 = vsyncpa [#allocation4], 0  ;;  %s189_s9 = smov [#allocation3]   ;;  %s237_s0 = inlined_call_operand.vmem [shape: f32[2,32], index: 0, kind: input, shape index: {}]   ;;  %s238_s1 = inlined_call_operand.hbm [shape: f32[8,2,32], index: 1, kind: input, shape index: {}]   ;;  %s239_s2 = inlined_call_operand.vmem [shape: f32[8,2], index: 2, kind: output, shape index: {}]  }
   0x1   :  { %s15_s10 = sshll.u32 %s189_s9, 4  ;;  %s165_s13 = scalar_lea.hbm %s238_s1, 256  ;;  %s16_s10 = int_to_ptr.vmem [resolvable:$true] %s15_s10 }
   0x2   :  { %p166_p0 = scmp.ne.s32.totalorder %s238_s1, %s165_s13  ;;  %p169_p1 = scmp.lt.u32.totalorder %s165_s13, %s238_s1 }
   0x4   :  { %p171_p2 = pnand %p169_p1, %p166_p0 }
   0x6   :  { %174 = shalt.err (!%p171_p2)
}
   0x7   :  { %s175_s18 = scalar_lea.vmem %s16_s10, 256  ;;  %p180_p4 = scmp.lt.s32.totalorder %s16_s10, %s16_s10 }
   0x8   :  { %p176_p3 = scmp.ne.s32.totalorder %s16_s10, %s175_s18  ;;  %p181_p5 = scmp.lt.s32.totalorder %s175_s18, %s175_s18 }
   0xa   :  { %p182_p6 = por %p181_p5, %p180_p4 }
   0xc   :  { %p183_p7 = pnand %p182_p6, %p176_p3 }
   0xe   :  { %186 = shalt.err (!%p183_p7)
}
   0xf   :  { %s190_s19 = smov 32   ;;  %s191_s20 = smov 2  }
  0x10   :  { %21 = dma.hbm_to_vmem [thread:$0]  %s238_s1, 256, %s16_s10, [#allocation4], %s190_s19, %s190_s19, %s191_s20  }
  0x11   :  { %187 = dma.done.wait [#allocation4], 256  }
  0x12   :  { %188 = vsyncadd [#allocation4], 4294967040  ;;  %vm42_vm0 = vcmask 254976   ;;  %v25_v0 = vld [vmem:[%s237_s0] sm:$0x3]  ;;  %v76_v25 = vlaneseq  ;;  %vm110_vm1 = vcmask 1041409  }
  0x13   :  { %v26_v1 = vld [vmem:[#allocation3] sm:$0x3]  ;;  %v28_v2 = vld [vmem:[#allocation3 + $0x4] sm:$0x3]  ;;  %v27_v5 = vld [vmem:[#allocation3 + $0x2] sm:$0x3] }
  0x14   :  { %v34_v3 = vmul.f32 %v26_v1, %v25_v0  ;;  %v36_v4 = vmul.f32 %v28_v2, %v25_v0  ;;  %v29_v6 = vld [vmem:[#allocation3 + $0x6] sm:$0x3]  ;;  %v35_v7 = vmul.f32 %v27_v5, %v25_v0  ;;  %v30_v9 = vld [vmem:[#allocation3 + $0x8] sm:$0x3]  ;;  %v31_v10 = vld [vmem:[#allocation3 + $0xa] sm:$0x3] }
  0x15   :  { %v37_v8 = vmul.f32 %v29_v6, %v25_v0  ;;  %v38_v15 = vmul.f32 %v30_v9, %v25_v0  ;;  %v39_v16 = vmul.f32 %v31_v10, %v25_v0  ;;  %v32_v17 = vld [vmem:[#allocation3 + $0xc] sm:$0x3]  ;;  %v33_v18 = vld [vmem:[#allocation3 + $0xe] sm:$0x3]  ;;  %v77_v26 = vand.u32 127, %v76_v25 }
  0x16   :  { %v43_v11 = vsel %vm42_vm0, %v34_v3, 0.0  ;;  %v49_v12 = vsel %vm42_vm0, %v36_v4, 0.0  ;;  %v46_v13 = vsel %vm42_vm0, %v35_v7, 0.0  ;;  %v40_v21 = vmul.f32 %v32_v17, %v25_v0 }
  0x17   :  { %44 = vadd.xlane.f32.xlu0 %v43_v11  ;;  %50 = vadd.xlane.f32.xlu1 %v49_v12  ;;  %v52_v14 = vsel %vm42_vm0, %v37_v8, 0.0  ;;  %v55_v19 = vsel %vm42_vm0, %v38_v15, 0.0  ;;  %v58_v20 = vsel %vm42_vm0, %v39_v16, 0.0  ;;  %v41_v22 = vmul.f32 %v33_v18, %v25_v0 }
  0x18   :  { %v61_v23 = vsel %vm42_vm0, %v40_v21, 0.0  ;;  %v79_v27 = vshrl.u32 %v76_v25, 7  ;;  %vm112_vm2 = vcmask 1042434   ;;  %vm114_vm3 = vcmask 1043459  }
  0x19   :  { %v64_v24 = vsel %vm42_vm0, %v41_v22, 0.0  ;;  %vm116_vm4 = vcmask 1044484   ;;  %vm118_vm5 = vcmask 1045509   ;;  %vm120_vm6 = vcmask 1046534  }
  0x1a   :  { %v80_v30 = vsub.s32 %v77_v26, %v79_v27  ;;  %vm122_vm7 = vcmask 1047559   ;;  %vm126_vm8 = vcmask 15360  }
  0x1b   :  { %47 = vadd.xlane.f32.xlu0 %v46_v13  ;;  %53 = vadd.xlane.f32.xlu1 %v52_v14 }
  0x1f   :  { %56 = vadd.xlane.f32.xlu0 %v55_v19  ;;  %59 = vadd.xlane.f32.xlu1 %v58_v20 }
  0x23   :  { %62 = vadd.xlane.f32.xlu0 %v61_v23  ;;  %65 = vadd.xlane.f32.xlu1 %v64_v24 }
  0xa4   :  { %v45_v28 = vpop.xlane.xlu0 %44  ;;  %v51_v29 = vpop.xlane.xlu1 %50 }
  0xa5   :  { %v81_v33 = vrot.slane %v45_v28, %v80_v30  ;;  %v89_v36 = vrot.slane %v51_v29, %v80_v30 }
  0xa8   :  { %v48_v31 = vpop.xlane.xlu0 %47  ;;  %v54_v32 = vpop.xlane.xlu1 %53 }
  0xa9   :  { %v85_v34 = vrot.slane %v48_v31, %v80_v30  ;;  %v93_v35 = vrot.slane %v54_v32, %v80_v30 }
  0xab   :  { %v111_v37 = vsel %vm110_vm1, %v85_v34, %v81_v33 }
  0xac   :  { %v113_v38 = vsel %vm112_vm2, %v89_v36, %v111_v37  ;;  %v57_v39 = vpop.xlane.xlu0 %56  ;;  %v60_v40 = vpop.xlane.xlu1 %59 }
  0xad   :  { %v115_v41 = vsel %vm114_vm3, %v93_v35, %v113_v38  ;;  %v97_v42 = vrot.slane %v57_v39, %v80_v30  ;;  %v101_v43 = vrot.slane %v60_v40, %v80_v30 }
  0xaf   :  { %v117_v44 = vsel %vm116_vm4, %v97_v42, %v115_v41 }
  0xb0   :  { %v63_v45 = vpop.xlane.xlu0 %62  ;;  %v66_v46 = vpop.xlane.xlu1 %65  ;;  %v119_v49 = vsel %vm118_vm5, %v101_v43, %v117_v44 }
  0xb1   :  { %v105_v47 = vrot.slane %v63_v45, %v80_v30  ;;  %v109_v48 = vrot.slane %v66_v46, %v80_v30 }
  0xb3   :  { %v121_v50 = vsel %vm120_vm6, %v105_v47, %v119_v49 }
  0xb4   :  { %v123_v51 = vsel %vm122_vm7, %v109_v48, %v121_v50 }
  0xb5   :  { %127 = vst.msk [vmem:[#allocation2] sm:$0xff] %vm126_vm8, %v123_v51 }
  0xbc   :  { %v132_v52 = vld [vmem:[#allocation2] sm:$0xff] }
  0xbd   :  { %v133_v53 = vsel %vm126_vm8, %v132_v52, -inf }
  0xbe   :  { %v134_v54 = vrot.slane %v133_v53, 4 }
  0xc0   :  { %v135_v55 = vmax.f32 %v133_v53, %v134_v54 }
  0xc2   :  { %v136_v56 = vrot.slane %v135_v55, 2 }
  0xc4   :  { %v137_v57 = vmax.f32 %v135_v55, %v136_v56 }
  0xc6   :  { %v138_v58 = vrot.slane %v137_v57, 1 }
  0xc8   :  { %v139_v59 = vmax.f32 %v137_v57, %v138_v58 }
  0xca   :  { %v140_v60 = vsub.f32 %v132_v52, %v139_v59 }
  0xcc   :  { %v141_v61 = vmul.f32 1.442695, %v140_v60 }
  0xce   :  { %161 = vpow2.f32 %v141_v61 }
  0xd8   :  { %v162_v62 = vpop.eup %161 }
  0xd9   :  { %v143_v63 = vsel %vm126_vm8, %v162_v62, 0.0 }
  0xda   :  { %v144_v0 = vrot.slane %v143_v63, 4 }
  0xdc   :  { %v145_v1 = vadd.f32 %v144_v0, %v143_v63 }
  0xde   :  { %v146_v2 = vrot.slane %v145_v1, 2 }
  0xe0   :  { %v147_v3 = vadd.f32 %v146_v2, %v145_v1 }
  0xe2   :  { %v148_v4 = vrot.slane %v147_v3, 1 }
  0xe4   :  { %v149_v5 = vadd.f32 %v148_v4, %v147_v3 }
  0xe6   :  { %163 = vrcp.f32 %v149_v5 }
  0xf0   :  { %v164_v6 = vpop.eup %163 }
  0xf1   :  { %v151_v7 = vmul.f32 %v164_v6, %v162_v62 }
  0xf3   :  { %152 = vst.msk [vmem:[%s239_s2] sm:$0xff] %vm126_vm8, %v151_v7 }
  0xf4   :  { %157 = vsyncpa [#allocation4], 1 }

</bundles_post_ra>
